<compile_context>
chip_gen: v6e
topology: v6e:2x2x1
jax: 0.10.0
libtpu: 0.0.40
codegen_flags: <defaults>
</compile_context>

<pallas_src>
import functools

import jax
import jax.numpy as jnp
from jax.experimental import pallas as pl
from jax.experimental.pallas import tpu as pltpu


def _round_up(a, b):
    return (a + b - 1) // b * b


def _img_ch_layernorm_kernel(x_ref, w_ref, b_ref, o_ref, *, eps, inv_c):
    # x_ref: (Bt, C, T)  -- Bt batch elements, one spatial tile of T lanes.
    # w_ref, b_ref: (C, 1) per-channel affine params (resident across the grid).
    x = x_ref[...].astype(jnp.float32)                       # (Bt, C, T)

    # Two-pass statistics over the channel axis (matches torch: mean, centered 2nd moment).
    mean = jnp.sum(x, axis=1, keepdims=True) * inv_c         # (Bt, 1, T)
    xc = x - mean
    var = jnp.sum(xc * xc, axis=1, keepdims=True) * inv_c    # biased variance

    y = xc * jax.lax.rsqrt(var + eps)                        # normalized

    w = w_ref[...].astype(jnp.float32)                       # (C, 1) -> broadcasts (1, C, 1)
    b = b_ref[...].astype(jnp.float32)
    o_ref[...] = (w * y + b).astype(o_ref.dtype)


def _select_tiling(B, C, HW, itemsize, target_block_bytes=4 * 1024 * 1024):
    """Pick (batch_block, spatial_tile, padded_C) from a VMEM byte budget."""
    # Sub-32-bit dtypes pack along sublanes: pad C to 8 (f32) / 16 (bf16) / 32 (int8).
    pack = max(1, 4 // itemsize)
    c_pad = _round_up(C, 8 * pack)
    col_bytes = c_pad * itemsize                 # padded bytes of one lane, one batch element

    full_hw_bytes = col_bytes * HW
    if full_hw_bytes <= target_block_bytes:
        # Whole spatial extent fits: one fully contiguous HBM slab per batch element.
        # Fill the remaining budget by blocking multiple batch elements together.
        t_hw = HW
        bt_cap = max(1, min(B, target_block_bytes // max(1, full_hw_bytes)))
        bt = 1
        for d in range(bt_cap, 0, -1):           # largest divisor of B within the budget
            if B % d == 0:
                bt = d
                break
    else:
        # Must split HW: multiple-of-128 tile, preferring one that divides HW
        # (avoids a masked trailing tile).
        bt = 1
        max_lanes = max(128, (target_block_bytes // col_bytes) // 128 * 128)
        t_hw = min(max_lanes, HW)
        if HW % t_hw != 0:
            for cand in range(t_hw, 127, -128):
                if HW % cand == 0:
                    t_hw = cand
                    break

    # Keep >= 2 blocks in the grid so both v7x TensorCores get work.
    if pl.cdiv(B, bt) * pl.cdiv(HW, t_hw) < 2:
        if B >= 2:
            bt = max(1, B // 2)
        elif HW >= 256:
            t_hw = max(128, (HW // 2) // 128 * 128)

    return bt, t_hw, c_pad


def img_ch_layernorm(x, weight, bias, eps=1e-5):
    """Channel LayerNorm over NCHW input.

    x:      (B, C, H, W)
    weight: (C,)
    bias:   (C,)
    """
    B, C, H, W = x.shape
    HW = H * W
    itemsize = jnp.dtype(x.dtype).itemsize

    # Lane-dense presentation: fuse H and W into the last axis.
    x2 = x.reshape(B, C, HW)
    w2 = weight.reshape(C, 1)
    b2 = bias.reshape(C, 1)

    bt, t_hw, c_pad = _select_tiling(B, C, HW, itemsize)
    grid_b = pl.cdiv(B, bt)
    grid_s = pl.cdiv(HW, t_hw)

    # VMEM budget: 2x double-buffered input + 2x double-buffered output
    # + ~2 f32 temporaries from the upcast/normalize pass + params/headroom.
    blk_bytes = bt * c_pad * t_hw * itemsize
    f32_tmp_bytes = 2 * bt * _round_up(C, 8) * t_hw * 4
    working = 4 * blk_bytes + f32_tmp_bytes + (1 << 20)
    vmem_limit = int(min(max(working, 16 << 20), 40 << 20))

    kernel = functools.partial(_img_ch_layernorm_kernel, eps=eps, inv_c=1.0 / C)

    out = pl.pallas_call(
        kernel,
        out_shape=jax.ShapeDtypeStruct((B, C, HW), x.dtype),
        grid_spec=pltpu.PrefetchScalarGridSpec(
            num_scalar_prefetch=0,
            grid=(grid_b, grid_s),
            in_specs=[
                pl.BlockSpec((bt, C, t_hw), lambda b, s: (b, 0, s)),
                pl.BlockSpec((C, 1), lambda b, s: (0, 0)),   # resident params
                pl.BlockSpec((C, 1), lambda b, s: (0, 0)),   # resident params
            ],
            out_specs=pl.BlockSpec((bt, C, t_hw), lambda b, s: (b, 0, s)),
        ),
        compiler_params=pltpu.CompilerParams(
            dimension_semantics=("parallel", "parallel"),
            vmem_limit_bytes=vmem_limit,
        ),
    )(x2, w2, b2)

    return out.reshape(B, C, H, W)


def img_ch_layernorm_ref(x, weight, bias, eps=1e-5):
    """Pure-JAX reference matching the PyTorch module semantics."""
    u = jnp.mean(x, axis=1, keepdims=True)
    s = jnp.mean((x - u) ** 2, axis=1, keepdims=True)
    xn = (x - u) / jnp.sqrt(s + eps)
    return weight[None, :, None, None] * xn + bias[None, :, None, None]


if __name__ == "__main__":
    key = jax.random.PRNGKey(0)
    B, C, H, W = 2, 4, 16, 16

    kx, kw, kb = jax.random.split(key, 3)
    x = jax.random.normal(kx, (B, C, H, W), dtype=jnp.float32)
    # Matches nn.Parameter(ones) / nn.Parameter(zeros), with a small perturbation
    # so the affine transform is actually exercised.
    weight = jnp.ones((C,), dtype=jnp.float32) + 0.1 * jax.random.normal(kw, (C,), dtype=jnp.float32)
    bias = jnp.zeros((C,), dtype=jnp.float32) + 0.1 * jax.random.normal(kb, (C,), dtype=jnp.float32)

    out = img_ch_layernorm(x, weight, bias, eps=1e-5)
    out = jax.block_until_ready(out)

    ref = img_ch_layernorm_ref(x, weight, bias, eps=1e-5)
    assert out.shape == (B, C, H, W)
    assert jnp.allclose(out, ref, atol=1e-4, rtol=1e-4), "mismatch vs reference"

    print("KERNEL_OK")
</pallas_src>

<mosaic_0001>
module attributes {stable_mosaic.version = 11 : i64} {
  func.func @_img_ch_layernorm_kernel(%arg0: i32, %arg1: i32, %arg2: memref<1x4x256xf32, #tpu.memory_space<vmem>>, %arg3: memref<4x1xf32, #tpu.memory_space<vmem>>, %arg4: memref<4x1xf32, #tpu.memory_space<vmem>>, %arg5: memref<1x4x256xf32, #tpu.memory_space<vmem>>) attributes {dimension_semantics = [#tpu.dimension_semantics<parallel>, #tpu.dimension_semantics<parallel>], iteration_bounds = array<i64: 2, 1>, scalar_prefetch = 0 : i64, scratch_operands = 0 : i64, tpu.core_type = #tpu.core_type<tc>, window_params = [{transform_indices = @transform_0, window_bounds = array<i64: 1, 4, 256>}, {pipeline_mode = #tpu.pipeline_mode<synchronous>, transform_indices = @transform_1, window_bounds = array<i64: 4, 1>}, {pipeline_mode = #tpu.pipeline_mode<synchronous>, transform_indices = @transform_2, window_bounds = array<i64: 4, 1>}, {transform_indices = @transform_3, window_bounds = array<i64: 1, 4, 256>}]} {
    %c0 = arith.constant 0 : index
    %c0_0 = arith.constant 0 : index
    %c0_1 = arith.constant 0 : index
    %0 = vector.load %arg2[%c0, %c0_0, %c0_1] : memref<1x4x256xf32, #tpu.memory_space<vmem>>, vector<1x4x256xf32>
    %cst = arith.constant dense<0.000000e+00> : vector<1x256xf32>
    %1 = vector.multi_reduction <add>, %0, %cst [1] : vector<1x4x256xf32> to vector<1x256xf32>
    %2 = vector.shape_cast %1 : vector<1x256xf32> to vector<1x1x256xf32>
    %cst_2 = arith.constant 2.500000e-01 : f32
    %3 = vector.broadcast %cst_2 : f32 to vector<1x1x256xf32>
    %4 = arith.mulf %2, %3 : vector<1x1x256xf32>
    %5 = vector.broadcast %4 : vector<1x1x256xf32> to vector<1x4x256xf32>
    %6 = arith.subf %0, %5 : vector<1x4x256xf32>
    %7 = arith.mulf %6, %6 : vector<1x4x256xf32>
    %cst_3 = arith.constant dense<0.000000e+00> : vector<1x256xf32>
    %8 = vector.multi_reduction <add>, %7, %cst_3 [1] : vector<1x4x256xf32> to vector<1x256xf32>
    %9 = vector.shape_cast %8 : vector<1x256xf32> to vector<1x1x256xf32>
    %cst_4 = arith.constant 2.500000e-01 : f32
    %10 = vector.broadcast %cst_4 : f32 to vector<1x1x256xf32>
    %11 = arith.mulf %9, %10 : vector<1x1x256xf32>
    %cst_5 = arith.constant 9.99999974E-6 : f32
    %12 = vector.broadcast %cst_5 : f32 to vector<1x1x256xf32>
    %13 = arith.addf %11, %12 : vector<1x1x256xf32>
    %14 = math.rsqrt %13 : vector<1x1x256xf32>
    %15 = vector.broadcast %14 : vector<1x1x256xf32> to vector<1x4x256xf32>
    %16 = arith.mulf %6, %15 : vector<1x4x256xf32>
    %c0_6 = arith.constant 0 : index
    %c0_7 = arith.constant 0 : index
    %17 = vector.load %arg3[%c0_6, %c0_7] : memref<4x1xf32, #tpu.memory_space<vmem>>, vector<4x1xf32>
    %c0_8 = arith.constant 0 : index
    %c0_9 = arith.constant 0 : index
    %18 = vector.load %arg4[%c0_8, %c0_9] : memref<4x1xf32, #tpu.memory_space<vmem>>, vector<4x1xf32>
    %19 = vector.shape_cast %17 : vector<4x1xf32> to vector<1x4x1xf32>
    %20 = vector.broadcast %19 : vector<1x4x1xf32> to vector<1x4x256xf32>
    %21 = arith.mulf %20, %16 : vector<1x4x256xf32>
    %22 = vector.shape_cast %18 : vector<4x1xf32> to vector<1x4x1xf32>
    %23 = vector.broadcast %22 : vector<1x4x1xf32> to vector<1x4x256xf32>
    %24 = arith.addf %21, %23 : vector<1x4x256xf32>
    %c0_10 = arith.constant 0 : index
    %c0_11 = arith.constant 0 : index
    %c0_12 = arith.constant 0 : index
    %25 = vector.load %arg5[%c0_10, %c0_11, %c0_12] : memref<1x4x256xf32, #tpu.memory_space<vmem>>, vector<1x4x256xf32>
    tpu.vector_store %arg5[%c0_10, %c0_11, %c0_12], %24 {strides = array<i32>} : memref<1x4x256xf32, #tpu.memory_space<vmem>>, vector<1x4x256xf32>,
    return
  }
  func.func @transform_0(%arg0: i32, %arg1: i32) -> (i32, i32, i32) {
    %c0_i32 = arith.constant 0 : i32
    %c0_i32_0 = arith.constant 0 : i32
    return %arg0, %c0_i32, %arg1 : i32, i32, i32
  }
  func.func @transform_1(%arg0: i32, %arg1: i32) -> (i32, i32) {
    %c0_i32 = arith.constant 0 : i32
    %c0_i32_0 = arith.constant 0 : i32
    %c0_i32_1 = arith.constant 0 : i32
    return %c0_i32, %c0_i32_0 : i32, i32
  }
  func.func @transform_2(%arg0: i32, %arg1: i32) -> (i32, i32) {
    %c0_i32 = arith.constant 0 : i32
    %c0_i32_0 = arith.constant 0 : i32
    %c0_i32_1 = arith.constant 0 : i32
    return %c0_i32, %c0_i32_0 : i32, i32
  }
  func.func @transform_3(%arg0: i32, %arg1: i32) -> (i32, i32, i32) {
    %c0_i32 = arith.constant 0 : i32
    %c0_i32_0 = arith.constant 0 : i32
    return %arg0, %c0_i32, %arg1 : i32, i32, i32
  }
}

</mosaic_0001>

<bundles_post_ra>
// kernel: tpu_custom_call.1
= control target key start
LH: loop header
LB: loop body
LE: loop exit
PB: predicated region body
PF: predicated region fallthrough
CT: control target
= control target key end

     0   :  { %8 = vsyncpa [#allocation3], 0  ;;  %s754_s0 = inlined_call_operand.hbm [shape: f32[2,4,256], index: 0, kind: input, shape index: {}]   ;;  %s755_s1 = inlined_call_operand.vmem [shape: f32[4,1], index: 1, kind: input, shape index: {}]   ;;  %s756_s2 = inlined_call_operand.vmem [shape: f32[4,1], index: 2, kind: input, shape index: {}]   ;;  %s757_s3 = inlined_call_operand.hbm [shape: f32[2,4,256], index: 3, kind: output, shape index: {}]  }
   0x1   :  { %10 = vsyncpa [#allocation3 + $0x1], 0 }
   0x2   :  { %11 = vsyncpa [#allocation4], 0 }
   0x3   :  { %13 = vsyncpa [#allocation4 + $0x1], 0  ;;  %s606_s12 = smov 0   ;;  %s608_s13 = smov 0  }
   0x4   :  { %s610_s14 = smov 0   ;;  %s612_s15 = smov 0  }
   0x5   :  { %s614_s16 = smov 0   ;;  %s616_s17 = smov 0  }
   0x6 LB: > { %s387_s18 = sadd.s32 4294967295, %s581_s17   ;;  %s388_s19 = sadd.s32 4294967294, %s581_s17   ;;  %s581_s17 = sphi %s616_s17, %s19_s17   ;;  %s577_s16 = sphi %s614_s16, %s769_s16   ;;  %s573_s15 = sphi %s612_s15, %s768_s15   ;;  %s569_s14 = sphi %s610_s14, %s767_s14   ;;  %s565_s13 = sphi %s608_s13, %s766_s13   ;;  %s561_s12 = sphi %s606_s12, %s765_s12  }
   0x7   : > { %s31_s20 = sadd.s32 1, %s577_s16  ;;  %s40_s21 = sadd.s32 1, %s569_s14 }
   0x8   : > { %p33_p0 = scmp.ge.s32.totalorder %s31_s20, 2  ;;  %p47_p1 = scmp.ne.s32.totalorder %s569_s14, %s565_s13 }
   0x9   : > { %p48_p2 = scmp.eq.s32.totalorder %s581_s17, 0  ;;  %p53_p3 = scmp.ne.s32.totalorder %s565_s13, %s561_s12 }
   0xa   : > { %s771_s20 = smov (%p33_p0, %s31_s20), 0  ;;  %p54_p5 = scmp.eq.s32.totalorder %s387_s18, 0 }
   0xb   : > { %p647_p4 = por %p48_p2, %p47_p1  ;;  %s35_s23 = ssub.s32 %s577_s16, %s771_s20 }
   0xc   : > { %p121_p6 = scmp.eq.s32.totalorder %s387_s18, 1  ;;  %p38_p7 = scmp.eq.s32.totalorder %s35_s23, 0 }
   0xd   : > { %p653_p8 = por %p54_p5, %p53_p3  ;;  %p127_p10 = scmp.eq.s32.totalorder %s388_s19, 1 }
   0xe   : > { %p657_p9 = por %p121_p6, %p47_p1  ;;  %p416_p13 = scmp.lt.s32.totalorder %s581_s17, 2 }
   0xf   : > { %s662_s26 = scalar_select %p38_p7, %s569_s14, %s40_s21  }
  0x10   : > { %p664_p11 = por %p127_p10, %p53_p3  ;;  %s153_s28 = sand.u32 1, %s569_s14  }
  0x11   : > { %s391_s29 = sshll.u32 %s153_s28, 3  ;;  %s402_s30 = sshll.u32 %s577_s16, 7 }
  0x12   : > { %s761_s27 = scalar_select %p664_p11, 1, 0 }
  0x13   : > { %s165_s6 = scalar_lea.hbm %s754_s0, %s402_s30  ;;  %s157_s7 = scalar_lea.vmem [#allocation2], %s391_s29 }
  0x14   : > { %s167_s8 = sshll.u32 %s157_s7, 4  ;;  %p677_p0 = pnand %p416_p13, %p647_p4  ;;  %s168_s8 = int_to_ptr.vmem [resolvable:$true] %s167_s8 }
  0x15   : > { %p394_p1 = scmp.ge.s32.totalorder %s581_s17, 1  ;;  %p172_p2 = scmp.lt.s32.totalorder %s581_s17, 3 }
  0x16   : > { %s154_s10 = scalar_lea.sflag [#allocation3], %s153_s28  ;;  %p475_p3 = pneg %p677_p0 }
  0x17   : > { %s486_s11 = scalar_lea.vmem %s168_s8, 128  ;;  %s583_s18 = smov [#allocation2]  }
  0x18   : > { %p487_p5 = scmp.ne.s32.totalorder %s168_s8, %s486_s11  ;;  %s491_s19 = sshll.u32 %s583_s18, 4  ;;  %s492_s19 = int_to_ptr.vmem [resolvable:$false] %s491_s19 }
  0x19   : > { %s493_s21 = scalar_lea.vmem %s492_s19, 256  ;;  %p494_p10 = scmp.lt.s32.totalorder %s168_s8, %s492_s19 }
  0x1a   : > { %p489_p6 = pnand %p487_p5, %p475_p3  ;;  %p495_p12 = scmp.lt.s32.totalorder %s493_s21, %s486_s11 }
  0x1c   : > { %p490_p7 = pneg %p489_p6  ;;  %p496_p4 = por %p495_p12, %p494_p10 }
  0x1e   : > { %p497_p13 = pnand %p496_p4, %p490_p7 }
  0x20   : > { %500 = shalt.err (!%p497_p13)
}
  0x21   : > { %411 = dma.hbm_to_vmem [thread:$0]  (!%p677_p0), %s165_s6, 128, %s168_s8, %s154_s10  }
  0x22   : > { %p173_p11 = pnand %p394_p1, %p172_p2 }
  0x23   : > { %s692_s22 = sand.u32 (!%p173_p11), 1, %s565_s13  }
  0x24   : > { %176 = sbr.rel (%p173_p11) target bundleno = 189 (0xbd), region = 32  ;;  %s395_s23 = sshll.u32 (!%p173_p11), %s692_s22, 3 }
  0x25   : > { %s179_s28 = scalar_lea.sflag (!%p173_p11), [#allocation3], %s692_s22  ;;  %s182_s29 = scalar_lea.vmem (!%p173_p11), [#allocation2], %s395_s23 }
  0x29   : > { %552 = dma.done.wait (%p653_p8), %s179_s28, 128  }
  0x2a   : > { %554 = vsyncadd (%p653_p8), %s179_s28, 4294967168  ;;  %v584_v0 = vmov 0   ;;  %v262_v1 = vld [vmem:[%s755_s1] sm:$0xf]  ;;  %vm211_vm0 = vcmask 1043456   ;;  %s403_s24 = sshll.u32 %s573_s15, 7 }
  0x2b   : > { %467 = vset.pattern.permute.xlu0 %v584_v0  ;;  %v263_v2 = vld [vmem:[%s756_s2] sm:$0xf]  ;;  %s204_s7 = scalar_lea.vmem [#allocation5], %s395_s23  ;;  %s301_s11 = scalar_lea.hbm %s757_s3, %s403_s24 }
  0x2c   : > { %266 = vperm.xlu0 %467, %v262_v1   ;;  %v207_v3 = vld [vmem:[%s182_s29] sm:$0xff]  ;;  %s303_s8 = sshll.u32 %s204_s7, 4  ;;  %s287_s18 = scalar_lea.sflag [#allocation4], %s692_s22  ;;  %s304_s8 = int_to_ptr.vmem [resolvable:$true] %s303_s8 }
  0x2d   : > { %v209_v4 = vcombine.high %v207_v3, %v207_v3  ;;  %v212_v5 = vsel %vm211_vm0, %v207_v3, 0.0  ;;  %s501_s19 = scalar_lea.vmem %s304_s8, 128  ;;  %s585_s21 = smov [#allocation5]  }
  0x2e   : > { %v213_v7 = vrot.slane %v212_v5, 4  ;;  %p502_p8 = scmp.ne.s32.totalorder %s304_s8, %s501_s19  ;;  %s505_s15 = sshll.u32 %s585_s21, 4  ;;  %s506_s15 = int_to_ptr.vmem [resolvable:$false] %s505_s15 }
  0x2f   : > { %v219_v6 = vsel %vm211_vm0, %v209_v4, 0.0  ;;  %s507_s23 = scalar_lea.vmem %s506_s15, 256  ;;  %p508_p0 = scmp.lt.s32.totalorder %s304_s8, %s506_s15 }
  0x30   : > { %276 = vperm.xlu0 %467, %v263_v2   ;;  %v220_v8 = vrot.slane %v219_v6, 4  ;;  %v214_v9 = vadd.f32 %v213_v7, %v212_v5  ;;  %p503_p11 = pnand %p502_p8, %p657_p9  ;;  %p509_p1 = scmp.lt.s32.totalorder %s507_s23, %s501_s19 }
  0x32   : > { %v221_v10 = vadd.f32 %v220_v8, %v219_v6  ;;  %v215_v11 = vrot.slane %v214_v9, 2  ;;  %p504_p12 = pneg %p503_p11  ;;  %p510_p2 = por %p509_p1, %p508_p0 }
  0x34   : > { %v222_v12 = vrot.slane %v221_v10, 2  ;;  %v216_v13 = vadd.f32 %v215_v11, %v214_v9  ;;  %p511_p3 = pnand %p510_p2, %p504_p12 }
  0x36   : > { %v223_v14 = vadd.f32 %v222_v12, %v221_v10  ;;  %v217_v15 = vrot.slane %v216_v13, 1 }
  0x38   : > { %v224_v16 = vrot.slane %v223_v14, 1  ;;  %v218_v17 = vadd.f32 %v217_v15, %v216_v13 }
  0x3a   : > { %v225_v18 = vadd.f32 %v224_v16, %v223_v14  ;;  %v226_v19 = vmul.f32 0.25, %v218_v17 }
  0x3c   : > { %v227_v20 = vmul.f32 0.25, %v225_v18 }
  0x3e   : > { %v230_v21 = vcombine.low %v226_v19, %v227_v20 }
  0x40   : > { %v232_v22 = vsub.f32 %v207_v3, %v230_v21 }
  0x42   : > { %v233_v23 = vmul.f32 %v232_v22, %v232_v22 }
  0x44   : > { %v235_v24 = vcombine.high %v233_v23, %v233_v23  ;;  %v237_v25 = vsel %vm211_vm0, %v233_v23, 0.0 }
  0x45   : > { %v238_v27 = vrot.slane %v237_v25, 4 }
  0x46   : > { %v244_v26 = vsel %vm211_vm0, %v235_v24, 0.0 }
  0x47   : > { %v245_v28 = vrot.slane %v244_v26, 4  ;;  %v239_v29 = vadd.f32 %v238_v27, %v237_v25 }
  0x49   : > { %v246_v30 = vadd.f32 %v245_v28, %v244_v26  ;;  %v240_v31 = vrot.slane %v239_v29, 2 }
  0x4b   : > { %v247_v32 = vrot.slane %v246_v30, 2  ;;  %v241_v33 = vadd.f32 %v240_v31, %v239_v29 }
  0x4d   : > { %v248_v34 = vadd.f32 %v247_v32, %v246_v30  ;;  %v242_v35 = vrot.slane %v241_v33, 1 }
  0x4f   : > { %v249_v36 = vrot.slane %v248_v34, 1  ;;  %v243_v37 = vadd.f32 %v242_v35, %v241_v33 }
  0x51   : > { %v250_v38 = vadd.f32 %v249_v36, %v248_v34  ;;  %v251_v39 = vmul.f32 0.25, %v243_v37 }
  0x53   : > { %v252_v40 = vmul.f32 0.25, %v250_v38  ;;  %v253_v41 = vadd.f32 1e-05, %v251_v39 }
  0x55   : > { %v254_v42 = vadd.f32 1e-05, %v252_v40  ;;  %469 = vrsqrt.f32 %v253_v41 }
  0x57   : > { %471 = vrsqrt.f32 %v254_v42 }
  0x62   : > { %v470_v43 = vpop.eup %469 }
  0x64   : > { %v472_v44 = vpop.eup %471 }
  0x65   : > { %v259_v45 = vcombine.low %v470_v43, %v472_v44 }
  0x67   : > { %v261_v46 = vmul.f32 %v259_v45, %v232_v22 }
  0x69   : > { %v270_v47 = vcombine.high %v261_v46, %v261_v46 }
  0xa7   : > { %v267_v48 = vpop.permute.xlu0 %266 }
  0xa8   : > { %v272_v49 = vmul.f32 %v267_v48, %v261_v46  ;;  %v273_v50 = vmul.f32 %v270_v47, %v267_v48 }
  0xab   : > { %v277_v51 = vpop.permute.xlu0 %276 }
  0xac   : > { %v279_v52 = vadd.f32 %v277_v51, %v272_v49  ;;  %v280_v53 = vadd.f32 %v277_v51, %v273_v50 }
  0xae   : > { %v283_v54 = vcombine.low %v279_v52, %v280_v53 }
  0xb0   : > { %285 = vst [vmem:[%s204_s7] sm:$0xff] %v283_v54 }
  0xb1   : > { %514 = shalt.err (!%p511_p3)
}
  0xb2   : > { %s515_s28 = scalar_lea.hbm %s301_s11, 128  ;;  %s519_s30 = scalar_lea.hbm %s757_s3, 256 }
  0xb3   : > { %p516_p5 = scmp.ne.s32.totalorder %s301_s11, %s515_s28  ;;  %p520_p10 = scmp.lt.s32.totalorder %s301_s11, %s757_s3 }
  0xb4   : > { %p521_p4 = scmp.lt.s32.totalorder %s519_s30, %s515_s28 }
  0xb5   : > { %p517_p6 = pnand %p516_p5, %p657_p9 }
  0xb6   : > { %p522_p13 = por %p521_p4, %p520_p10 }
  0xb7   : > { %p518_p7 = pneg %p517_p6 }
  0xb9   : > { %p523_p8 = pnand %p522_p13, %p518_p7 }
  0xbb   : > { %526 = shalt.err (!%p523_p8)
}
  0xbc   : > { %406 = dma.vmem_to_hbm [thread:$0]  (%p657_p9), %s304_s8, 128, %s301_s11, %s287_s18  }
  0xbd PF: > { %s315_s6 = sand.u32 1, %s561_s12   ;;  %p763_p11 = scmp.ne.s32.totalorder %s761_s27, 0 }
  0xbe   : > { %p764_p12 = scmp.ge.s32.totalorder %s581_s17, 2  ;;  %s316_s24 = scalar_lea.sflag [#allocation4], %s315_s6 }
  0xc0   : > { %p413_p0 = pnand %p764_p12, %p763_p11 }
  0xc2   : > { %p414_p1 = pneg %p413_p0 }
  0xc4   : > { %556 = dma.done.wait (%p414_p1), %s316_s24, 128  }
  0xc5   : > { %558 = vsyncadd (%p414_p1), %s316_s24, 4294967168  ;;  %s19_s17 = sadd.s32 1, %s581_s17   ;;  %s765_s12 = smov %s565_s13 }
  0xc6   : > { %p16_p2 = scmp.ge.s32.totalorder %s19_s17, 4   ;;  %s766_s13 = smov %s569_s14 }
  0xc7   : > { %s767_s14 = smov %s662_s26  ;;  %s768_s15 = smov %s577_s16 }
  0xc8   : > { %s769_s16 = smov %s771_s20  ;;  %18 = sbr.rel (!%p16_p2) target bundleno = 6 (0x6), region = 77 }
  0xcd   :  { %321 = vsyncpa [#allocation3], 1 }
  0xce   :  { %323 = vsyncpa [#allocation3 + $0x1], 1 }
  0xcf   :  { %324 = vsyncpa [#allocation4], 1 }
  0xd0   :  { %326 = vsyncpa [#allocation4 + $0x1], 1 }

</bundles_post_ra>
